<compile_context>
chip_gen: v7x
topology: tpu7x:2x2x1
jax: 0.10.0
libtpu: 0.0.40
codegen_flags: <defaults>
</compile_context>

<pallas_src>
import functools
import re

import numpy as np
import jax
import jax.numpy as jnp
from jax import lax
from jax.experimental import pallas as pl
from jax.experimental.pallas import tpu as pltpu


def _round_up(x: int, m: int) -> int:
    return (x + m - 1) // m * m


def _tpu_generation() -> int:
    try:
        kind = jax.devices()[0].device_kind.lower()
    except Exception:
        return 0
    m = re.search(r"(\d+)", kind)
    return int(m.group(1)) if m else 0


def _vmem_capacity(gen: int) -> int:
    try:
        return int(pltpu.get_tpu_info().vmem_capacity_bytes)
    except Exception:
        return (128 << 20) if gen in (5, 6) else (64 << 20)


def _aligner_kernel(x_ref, vinv_ref, v_ref, out_ref, *, topk, nv_real,
                    tie_bits, eps):
    """One [TILE_NT, D] tile of non-image text tokens vs. all visual tokens."""
    x = x_ref[...].astype(jnp.float32)                        # [T, D]

    # Row-wise L2 normalization: x / (||x|| + eps), EUP reciprocal.
    ss = jnp.sum(x * x, axis=-1, keepdims=True)
    inv_norm = pl.reciprocal(jnp.sqrt(ss) + eps, approx=True)
    x_norm = (x * inv_norm).astype(jnp.bfloat16)

    # sims[T, Nv] = (x_norm @ V^T) * (1 / (||V_j|| + eps)) == x_norm @ V_norm^T
    # without shipping a second resident bf16 copy of V. Contract both
    # operands on their last dim so the MXU consumes V directly.
    xv = lax.dot_general(
        x_norm, v_ref[...],
        dimension_numbers=(((1,), (1,)), ((), ())),
        preferred_element_type=jnp.float32)                   # [T, Nv]
    sims = xv * vinv_ref[...]                                 # [1, Nv] broadcast

    t, nv = sims.shape
    neg_inf = jnp.float32(-jnp.inf)
    col = lax.broadcasted_iota(jnp.int32, (t, nv), 1)
    if nv_real < nv:                                          # mask padded V cols
        sims = jnp.where(col < nv_real, sims, neg_inf)

    # ---- top-k ------------------------------------------------------------
    # Per-element int32 key: high bits = order-preserving encoding of the f32
    # sim, low `tie_bits` bits = (nv-1-col). Keys are unique within a row, so
    # each knockout step removes exactly one column and the final threshold
    # `keys >= kth_key` selects exactly the top-k columns.
    bits = pltpu.bitcast(sims, jnp.int32)
    mono = bits ^ (jnp.right_shift(bits, 31) & jnp.int32(0x7FFFFFFF))
    keys = (mono & jnp.int32(-(1 << tie_bits))) | (jnp.int32(nv - 1) - col)

    min_key = jnp.int32(jnp.iinfo(jnp.int32).min)

    def body(_, carry):
        keys_c, _ = carry
        best = jnp.max(keys_c, axis=-1, keepdims=True)        # 1 XLU reduce / row
        keys_c = jnp.where(keys_c == best, min_key, keys_c)   # knock out winner
        return keys_c, best

    _, kth_key = lax.fori_loop(
        0, topk, body,
        (keys, jnp.full((t, 1), min_key, jnp.int32)),
        unroll=True if topk <= 16 else 8)

    # Single full-array select after the loop (vs one per iteration before).
    selected = jnp.where(keys >= kth_key, sims, neg_inf)

    # Softmax over the selected sims only; the 1/sum normalization is folded
    # AFTER the matmul so the broadcast multiply is TxD (not TxNv) and applied
    # in f32 after MXU accumulation.
    row_max = jnp.max(selected, axis=-1, keepdims=True)
    e = jnp.exp(selected - row_max)                           # 0 where -inf
    denom = jnp.sum(e, axis=-1, keepdims=True)

    fused = jnp.dot(e.astype(jnp.bfloat16), v_ref[...],
                    preferred_element_type=jnp.float32)       # [T, D]
    fused = fused * pl.reciprocal(denom, approx=False)
    out_ref[...] = fused.astype(out_ref.dtype)


@functools.partial(
    jax.jit,
    static_argnames=("nt", "topk", "eps", "tile_nt", "pad_mult", "vmem_cap",
                     "gen"))
def _aligner_device(V, X, non_image_idx, *, nt, topk, eps, tile_nt, pad_mult,
                    vmem_cap, gen):
    nv, d = V.shape
    d_pad = _round_up(d, pad_mult)
    nv_pad = _round_up(nv, pad_mult)
    itemsize = jnp.dtype(X.dtype).itemsize

    # ---- tile sizing against the real per-generation VMEM budget -----------
    # TODO(synk): if the resident bf16 V (nv_pad*d_pad) itself does not fit in
    # VMEM, split the Nv axis across a second grid dimension and merge the
    # per-chunk top-k results.
    resident = nv_pad * d_pad * 2 + 2 * nv_pad * 4       # bf16 V (1 buf) + vinv row
    per_row = (2 * 2 * d_pad * itemsize                  # x/out tiles, double-buffered
               + 8 * nv_pad * 4                          # live f32/i32 [tile, Nv] temps
               + 6 * d_pad * 4)                          # f32 [tile, D] temps
    budget = vmem_cap - (8 << 20)
    tile_cap = max(8, ((budget - resident) // per_row) // 8 * 8)

    base_tile = tile_nt if tile_nt is not None else (
        128 if gen == 5 else 512 if gen == 6 else 256)
    tile = min(base_tile, tile_cap, 1024, _round_up(nt, 8))
    if gen >= 7 and nt > 8:
        # keep both v7x TensorCores busy along the "parallel" row axis
        tile = min(tile, _round_up(-(-nt // 2), 8))
    tile = max(8, tile // 8 * 8)
    nt_pad = _round_up(nt, tile)

    vmem_limit = int(max(min(budget, 110 << 20), 32 << 20))

    # ---- gather + pad (device side, fused under this jit) ------------------
    X_non_image = jnp.take(X, non_image_idx, axis=0)          # [nt, d]
    Xp = jnp.zeros((nt_pad, d_pad), X.dtype).at[:nt, :d].set(X_non_image)

    Vp = jnp.zeros((nv_pad, d_pad), jnp.float32).at[:nv, :d].set(
        V.astype(jnp.float32))
    v_inv = (1.0 / (jnp.sqrt(jnp.sum(Vp * Vp, axis=-1)) + eps)
             ).reshape(1, nv_pad).astype(jnp.float32)
    v_bf16 = Vp.astype(jnp.bfloat16)

    tie_bits = max(1, int(np.ceil(np.log2(nv_pad))))

    fused = pl.pallas_call(
        functools.partial(_aligner_kernel, topk=topk, nv_real=nv,
                          tie_bits=tie_bits, eps=eps),
        out_shape=jax.ShapeDtypeStruct((nt_pad, d_pad), X.dtype),
        grid=(nt_pad // tile,),
        in_specs=[
            pl.BlockSpec((tile, d_pad), lambda i: (i, 0)),       # text-token tile
            pl.BlockSpec((1, nv_pad), lambda i: (0, 0),          # 1/||V_j|| row
                         pipeline_mode=pl.Buffered(1)),
            pl.BlockSpec((nv_pad, d_pad), lambda i: (0, 0),      # V (resident)
                         pipeline_mode=pl.Buffered(1)),
        ],
        out_specs=pl.BlockSpec((tile, d_pad), lambda i: (i, 0)),
        compiler_params=pltpu.CompilerParams(
            dimension_semantics=("parallel",),
            vmem_limit_bytes=vmem_limit),
    )(Xp, v_inv, v_bf16)

    fused = fused[:nt, :d]
    # TODO(synk): write fused directly into a preallocated [Nt+Nx, D] buffer
    # via input_output_aliases to drop this concat copy.
    return jnp.concatenate([fused, X], axis=0)


def sequence_aligner(V, X, is_image_token, *, topk=100, tile_nt=None, eps=1e-8):
    """JAX/Pallas equivalent of SequenceAligner.forward -> [Nt + Nx, D]."""
    assert is_image_token.shape[0] == X.shape[0], "Mismatch in token length"
    nv, d = V.shape
    assert 1 <= topk <= nv, "topk must be in [1, num visual tokens]"

    # The number of non-image tokens is data dependent, so the index
    # computation stays host-side; everything else runs inside one jit.
    # TODO(synk): pass padded indices via PrefetchScalarGridSpec + an in-kernel
    # DMA row gather to remove the host nonzero / jnp.take / padded copy.
    non_image_idx = np.nonzero(~np.asarray(is_image_token))[0].astype(np.int32)
    nt = int(non_image_idx.shape[0])
    if nt == 0:
        return jnp.asarray(X)          # no text tokens -> output is just X

    gen = _tpu_generation()
    return _aligner_device(
        V, X, jnp.asarray(non_image_idx),
        nt=nt, topk=int(topk), eps=float(eps), tile_nt=tile_nt,
        pad_mult=256 if gen >= 6 else 128,
        vmem_cap=_vmem_capacity(gen), gen=gen)


if __name__ == "__main__":
    key = jax.random.PRNGKey(0)
    k_v, k_x = jax.random.split(key)

    # Small synthetic shapes: 64 visual tokens, 16 text tokens, hidden=32, topk=8.
    Nv, Nx, D = 64, 16, 32
    topk = 8

    V = jax.random.normal(k_v, (Nv, D), dtype=jnp.float32)
    X = jax.random.normal(k_x, (Nx, D), dtype=jnp.float32)
    # Deterministic token-type pattern: every 3rd token is an "image" token.
    is_image_token = jnp.asarray(
        np.array([i % 3 == 0 for i in range(Nx)], dtype=bool))

    out = sequence_aligner(V, X, is_image_token, topk=topk)
    out = jax.block_until_ready(out)

    nt = int(np.sum(~np.asarray(is_image_token)))
    assert out.shape == (nt + Nx, D), out.shape
    assert bool(jnp.all(jnp.isfinite(out)))
    print("KERNEL_OK")
</pallas_src>

<mosaic_0001>
module attributes {stable_mosaic.version = 11 : i64} {
  func.func @_aligner_kernel(%arg0: i32, %arg1: memref<16x128xf32, #tpu.memory_space<vmem>>, %arg2: memref<1x128xf32, #tpu.memory_space<vmem>>, %arg3: memref<128x128xbf16, #tpu.memory_space<vmem>>, %arg4: memref<16x128xf32, #tpu.memory_space<vmem>>) attributes {dimension_semantics = [#tpu.dimension_semantics<parallel>], iteration_bounds = array<i64: 1>, scalar_prefetch = 0 : i64, scratch_operands = 0 : i64, tpu.core_type = #tpu.core_type<tc>, window_params = [{transform_indices = @transform_0, window_bounds = array<i64: 16, 128>}, {pipeline_mode = #tpu.pipeline_mode<synchronous>, transform_indices = @transform_1, window_bounds = array<i64: 1, 128>}, {pipeline_mode = #tpu.pipeline_mode<synchronous>, transform_indices = @transform_2, window_bounds = array<i64: 128, 128>}, {transform_indices = @transform_3, window_bounds = array<i64: 16, 128>}]} {
    %c0 = arith.constant 0 : index
    %c0_0 = arith.constant 0 : index
    %0 = vector.load %arg1[%c0, %c0_0] : memref<16x128xf32, #tpu.memory_space<vmem>>, vector<16x128xf32>
    %1 = arith.mulf %0, %0 : vector<16x128xf32>
    %cst = arith.constant dense<0.000000e+00> : vector<16xf32>
    %2 = vector.multi_reduction <add>, %1, %cst [1] : vector<16x128xf32> to vector<16xf32>
    %3 = vector.shape_cast %2 : vector<16xf32> to vector<16x1xf32>
    %4 = math.sqrt %3 : vector<16x1xf32>
    %cst_1 = arith.constant 9.99999993E-9 : f32
    %5 = vector.broadcast %cst_1 : f32 to vector<16x1xf32>
    %6 = arith.addf %4, %5 : vector<16x1xf32>
    %7 = tpu.reciprocal %6 {approx = true} : vector<16x1xf32> -> vector<16x1xf32>
    %8 = vector.broadcast %7 : vector<16x1xf32> to vector<16x128xf32>
    %9 = arith.mulf %0, %8 : vector<16x128xf32>
    %10 = arith.truncf %9 : vector<16x128xf32> to vector<16x128xbf16>
    %c0_2 = arith.constant 0 : index
    %c0_3 = arith.constant 0 : index
    %11 = vector.load %arg3[%c0_2, %c0_3] : memref<128x128xbf16, #tpu.memory_space<vmem>>, vector<128x128xbf16>
    %cst_4 = arith.constant dense<0.000000e+00> : vector<16x128xf32>
    %12 = tpu.matmul %10, %11, %cst_4 {dimension_numbers = #tpu.dot_dimension_numbers<[1], [1], [0], [0], [0, 0, 1, 0], [], []>} : vector<16x128xbf16>, vector<128x128xbf16>, vector<16x128xf32> -> vector<16x128xf32>
    %c0_5 = arith.constant 0 : index
    %c0_6 = arith.constant 0 : index
    %13 = vector.load %arg2[%c0_5, %c0_6] : memref<1x128xf32, #tpu.memory_space<vmem>>, vector<1x128xf32>
    %14 = vector.broadcast %13 : vector<1x128xf32> to vector<16x128xf32>
    %15 = arith.mulf %12, %14 : vector<16x128xf32>
    %16 = tpu.iota {dimensions = array<i32: 1>} : vector<16x128xi32>
    %c64_i32 = arith.constant 64 : i32
    %17 = vector.broadcast %c64_i32 : i32 to vector<16x128xi32>
    %18 = arith.cmpi slt, %16, %17 : vector<16x128xi32>
    %cst_7 = arith.constant 0xFF800000 : f32
    %19 = vector.broadcast %cst_7 : f32 to vector<16x128xf32>
    %20 = arith.select %18, %15, %19 : vector<16x128xi1>, vector<16x128xf32>
    %21 = tpu.bitcast %20 : vector<16x128xf32> -> vector<16x128xi32>
    %c31_i32 = arith.constant 31 : i32
    %22 = vector.broadcast %c31_i32 : i32 to vector<16x128xi32>
    %23 = arith.shrsi %21, %22 : vector<16x128xi32>
    %c2147483647_i32 = arith.constant 2147483647 : i32
    %24 = vector.broadcast %c2147483647_i32 : i32 to vector<16x128xi32>
    %25 = arith.andi %23, %24 : vector<16x128xi32>
    %26 = arith.xori %21, %25 : vector<16x128xi32>
    %c-128_i32 = arith.constant -128 : i32
    %27 = vector.broadcast %c-128_i32 : i32 to vector<16x128xi32>
    %28 = arith.andi %26, %27 : vector<16x128xi32>
    %c127_i32 = arith.constant 127 : i32
    %29 = vector.broadcast %c127_i32 : i32 to vector<16x128xi32>
    %30 = arith.subi %29, %16 : vector<16x128xi32>
    %31 = arith.ori %28, %30 : vector<16x128xi32>
    %c-2147483648_i32 = arith.constant -2147483648 : i32
    %32 = vector.broadcast %c-2147483648_i32 : i32 to vector<16x1xi32>
    %c-2147483648_i32_8 = arith.constant -2147483648 : i32
    %c0_i32 = arith.constant 0 : i32
    %cst_9 = arith.constant dense<-2147483648> : vector<16xi32>
    %33 = vector.multi_reduction <maxsi>, %31, %cst_9 [1] : vector<16x128xi32> to vector<16xi32>
    %34 = vector.shape_cast %33 : vector<16xi32> to vector<16x1xi32>
    %35 = vector.broadcast %34 : vector<16x1xi32> to vector<16x128xi32>
    %36 = arith.cmpi eq, %31, %35 : vector<16x128xi32>
    %37 = vector.broadcast %c-2147483648_i32_8 : i32 to vector<16x128xi32>
    %38 = arith.select %36, %37, %31 : vector<16x128xi1>, vector<16x128xi32>
    %c1_i32 = arith.constant 1 : i32
    %cst_10 = arith.constant dense<-2147483648> : vector<16xi32>
    %39 = vector.multi_reduction <maxsi>, %38, %cst_10 [1] : vector<16x128xi32> to vector<16xi32>
    %40 = vector.shape_cast %39 : vector<16xi32> to vector<16x1xi32>
    %41 = vector.broadcast %40 : vector<16x1xi32> to vector<16x128xi32>
    %42 = arith.cmpi eq, %38, %41 : vector<16x128xi32>
    %43 = vector.broadcast %c-2147483648_i32_8 : i32 to vector<16x128xi32>
    %44 = arith.select %42, %43, %38 : vector<16x128xi1>, vector<16x128xi32>
    %c2_i32 = arith.constant 2 : i32
    %cst_11 = arith.constant dense<-2147483648> : vector<16xi32>
    %45 = vector.multi_reduction <maxsi>, %44, %cst_11 [1] : vector<16x128xi32> to vector<16xi32>
    %46 = vector.shape_cast %45 : vector<16xi32> to vector<16x1xi32>
    %47 = vector.broadcast %46 : vector<16x1xi32> to vector<16x128xi32>
    %48 = arith.cmpi eq, %44, %47 : vector<16x128xi32>
    %49 = vector.broadcast %c-2147483648_i32_8 : i32 to vector<16x128xi32>
    %50 = arith.select %48, %49, %44 : vector<16x128xi1>, vector<16x128xi32>
    %c3_i32 = arith.constant 3 : i32
    %cst_12 = arith.constant dense<-2147483648> : vector<16xi32>
    %51 = vector.multi_reduction <maxsi>, %50, %cst_12 [1] : vector<16x128xi32> to vector<16xi32>
    %52 = vector.shape_cast %51 : vector<16xi32> to vector<16x1xi32>
    %53 = vector.broadcast %52 : vector<16x1xi32> to vector<16x128xi32>
    %54 = arith.cmpi eq, %50, %53 : vector<16x128xi32>
    %55 = vector.broadcast %c-2147483648_i32_8 : i32 to vector<16x128xi32>
    %56 = arith.select %54, %55, %50 : vector<16x128xi1>, vector<16x128xi32>
    %c4_i32 = arith.constant 4 : i32
    %cst_13 = arith.constant dense<-2147483648> : vector<16xi32>
    %57 = vector.multi_reduction <maxsi>, %56, %cst_13 [1] : vector<16x128xi32> to vector<16xi32>
    %58 = vector.shape_cast %57 : vector<16xi32> to vector<16x1xi32>
    %59 = vector.broadcast %58 : vector<16x1xi32> to vector<16x128xi32>
    %60 = arith.cmpi eq, %56, %59 : vector<16x128xi32>
    %61 = vector.broadcast %c-2147483648_i32_8 : i32 to vector<16x128xi32>
    %62 = arith.select %60, %61, %56 : vector<16x128xi1>, vector<16x128xi32>
    %c5_i32 = arith.constant 5 : i32
    %cst_14 = arith.constant dense<-2147483648> : vector<16xi32>
    %63 = vector.multi_reduction <maxsi>, %62, %cst_14 [1] : vector<16x128xi32> to vector<16xi32>
    %64 = vector.shape_cast %63 : vector<16xi32> to vector<16x1xi32>
    %65 = vector.broadcast %64 : vector<16x1xi32> to vector<16x128xi32>
    %66 = arith.cmpi eq, %62, %65 : vector<16x128xi32>
    %67 = vector.broadcast %c-2147483648_i32_8 : i32 to vector<16x128xi32>
    %68 = arith.select %66, %67, %62 : vector<16x128xi1>, vector<16x128xi32>
    %c6_i32 = arith.constant 6 : i32
    %cst_15 = arith.constant dense<-2147483648> : vector<16xi32>
    %69 = vector.multi_reduction <maxsi>, %68, %cst_15 [1] : vector<16x128xi32> to vector<16xi32>
    %70 = vector.shape_cast %69 : vector<16xi32> to vector<16x1xi32>
    %71 = vector.broadcast %70 : vector<16x1xi32> to vector<16x128xi32>
    %72 = arith.cmpi eq, %68, %71 : vector<16x128xi32>
    %73 = vector.broadcast %c-2147483648_i32_8 : i32 to vector<16x128xi32>
    %74 = arith.select %72, %73, %68 : vector<16x128xi1>, vector<16x128xi32>
    %c7_i32 = arith.constant 7 : i32
    %cst_16 = arith.constant dense<-2147483648> : vector<16xi32>
    %75 = vector.multi_reduction <maxsi>, %74, %cst_16 [1] : vector<16x128xi32> to vector<16xi32>
    %76 = vector.shape_cast %75 : vector<16xi32> to vector<16x1xi32>
    %77 = vector.broadcast %76 : vector<16x1xi32> to vector<16x128xi32>
    %78 = arith.cmpi eq, %74, %77 : vector<16x128xi32>
    %79 = vector.broadcast %c-2147483648_i32_8 : i32 to vector<16x128xi32>
    %80 = arith.select %78, %79, %74 : vector<16x128xi1>, vector<16x128xi32>
    %81 = vector.broadcast %76 : vector<16x1xi32> to vector<16x128xi32>
    %82 = arith.cmpi sge, %31, %81 : vector<16x128xi32>
    %cst_17 = arith.constant 0xFF800000 : f32
    %83 = vector.broadcast %cst_17 : f32 to vector<16x128xf32>
    %84 = arith.select %82, %20, %83 : vector<16x128xi1>, vector<16x128xf32>
    %cst_18 = arith.constant dense<0xFF800000> : vector<16xf32>
    %85 = vector.multi_reduction <maximumf>, %84, %cst_18 [1] : vector<16x128xf32> to vector<16xf32>
    %86 = vector.shape_cast %85 : vector<16xf32> to vector<16x1xf32>
    %87 = vector.broadcast %86 : vector<16x1xf32> to vector<16x128xf32>
    %88 = arith.subf %84, %87 : vector<16x128xf32>
    %89 = math.exp %88 : vector<16x128xf32>
    %cst_19 = arith.constant dense<0.000000e+00> : vector<16xf32>
    %90 = vector.multi_reduction <add>, %89, %cst_19 [1] : vector<16x128xf32> to vector<16xf32>
    %91 = vector.shape_cast %90 : vector<16xf32> to vector<16x1xf32>
    %92 = arith.truncf %89 : vector<16x128xf32> to vector<16x128xbf16>
    %c0_20 = arith.constant 0 : index
    %c0_21 = arith.constant 0 : index
    %93 = vector.load %arg3[%c0_20, %c0_21] : memref<128x128xbf16, #tpu.memory_space<vmem>>, vector<128x128xbf16>
    %cst_22 = arith.constant dense<0.000000e+00> : vector<16x128xf32>
    %94 = tpu.matmul %92, %93, %cst_22 {dimension_numbers = #tpu.dot_dimension_numbers<[1], [0], [0], [1], [0, 0, 1, 1], [], []>} : vector<16x128xbf16>, vector<128x128xbf16>, vector<16x128xf32> -> vector<16x128xf32>
    %95 = tpu.reciprocal %91 : vector<16x1xf32> -> vector<16x1xf32>
    %96 = vector.broadcast %95 : vector<16x1xf32> to vector<16x128xf32>
    %97 = arith.mulf %94, %96 : vector<16x128xf32>
    %c0_23 = arith.constant 0 : index
    %c0_24 = arith.constant 0 : index
    %98 = vector.load %arg4[%c0_23, %c0_24] : memref<16x128xf32, #tpu.memory_space<vmem>>, vector<16x128xf32>
    tpu.vector_store %arg4[%c0_23, %c0_24], %97 {strides = array<i32>} : memref<16x128xf32, #tpu.memory_space<vmem>>, vector<16x128xf32>,
    return
  }
  func.func @transform_0(%arg0: i32) -> (i32, i32) {
    %c0_i32 = arith.constant 0 : i32
    %c0_i32_0 = arith.constant 0 : i32
    return %arg0, %c0_i32 : i32, i32
  }
  func.func @transform_1(%arg0: i32) -> (i32, i32) {
    %c0_i32 = arith.constant 0 : i32
    %c0_i32_0 = arith.constant 0 : i32
    %c0_i32_1 = arith.constant 0 : i32
    return %c0_i32, %c0_i32_0 : i32, i32
  }
  func.func @transform_2(%arg0: i32) -> (i32, i32) {
    %c0_i32 = arith.constant 0 : i32
    %c0_i32_0 = arith.constant 0 : i32
    %c0_i32_1 = arith.constant 0 : i32
    return %c0_i32, %c0_i32_0 : i32, i32
  }
  func.func @transform_3(%arg0: i32) -> (i32, i32) {
    %c0_i32 = arith.constant 0 : i32
    %c0_i32_0 = arith.constant 0 : i32
    return %arg0, %c0_i32 : i32, i32
  }
}

</mosaic_0001>

<bundles_post_ra>
// kernel: _aligner_device.1
= control target key start
LH: loop header
LB: loop body
LE: loop exit
PB: predicated region body
PF: predicated region fallthrough
CT: control target
= control target key end

     0   :  { %v591_v2 = vmov 0.0   ;;  %vm592_vm0 = vmmov 0   ;;  %v158_v32 = vlaneseq  ;;  %s686_s0 = inlined_call_operand.vmem [shape: f32[16,128], index: 0, kind: input, shape index: {}]   ;;  %s687_s2 = inlined_call_operand.vmem [shape: bf16[128,128], index: 2, kind: input, shape index: {}]   ;;  %s688_s1 = inlined_call_operand.vmem [shape: f32[1,128], index: 1, kind: input, shape index: {}]   ;;  %s689_s3 = inlined_call_operand.vmem [shape: f32[16,128], index: 3, kind: output, shape index: {}]  }
   0x1   :  { %v616_v0 = vld [vmem:[%s686_s0] sm:$0xff]  ;;  %v621_v1 = vld [vmem:[%s686_s0 + $0x8] sm:$0xff]  ;;  %525 = vmatprep.subr.bf16.mxu0 %v591_v2  ;;  %545 = vmatprep.subr.bf16.mxu1 %v591_v2  ;;  %v569_v7 = vld [vmem:[%s687_s2 + $0x10] sm:$0xff]  }
   0x2   :  { %v17_v3 = vmul.f32 %v616_v0, %v616_v0  ;;  %v567_v4 = vld [vmem:[%s687_s2] sm:$0xff]   ;;  %v18_v5 = vmul.f32 %v621_v1, %v621_v1  ;;  %v568_v6 = vld [vmem:[%s687_s2 + $0x8] sm:$0xff]   ;;  %v570_v8 = vld [vmem:[%s687_s2 + $0x18] sm:$0xff]   ;;  %541 = vmatprep.mubr.msk.bf16.mxu0 %vm592_vm0, %v591_v2  ;;  %561 = vmatprep.mubr.msk.bf16.mxu1 %vm592_vm0, %v591_v2  ;;  %v159_v33 = vand.u32 127, %v158_v32 }
   0x3   :  { %526 = vmatpush3.bf16.xpose.msra.mxu0 %v567_v4  ;;  %546 = vmatpush3.bf16.msra.mxu1 %v567_v4  ;;  %v571_v9 = vld [vmem:[%s687_s2 + $0x20] sm:$0xff]   ;;  %v572_v10 = vld [vmem:[%s687_s2 + $0x28] sm:$0xff]   ;;  %v573_v11 = vld [vmem:[%s687_s2 + $0x30] sm:$0xff]  }
   0x4   :  { %19 = vadd.xlane.f32.xlu0 %v17_v3  ;;  %527 = vmatprep.subr.bf16.mxu0 %v591_v2  ;;  %v574_v12 = vld [vmem:[%s687_s2 + $0x38] sm:$0xff]   ;;  %v506_v34 = vld [vmem:[%s688_s1] ss:$0 sm:$0xff]  ;;  %vm160_vm5 = vcmp.lt.s32.totalorder %v159_v33, 64  ;;  %v173_v47 = vsub.s32 127, %v159_v33 }
   0x5   :  { %547 = vmatprep.subr.bf16.mxu1 %v591_v2 }
   0x7   :  { %548 = vmatpush3.bf16.msra.mxu1 %v568_v6 }
   0x8   :  { %21 = vadd.xlane.f32.xlu0 %v18_v5  ;;  %549 = vmatprep.subr.bf16.mxu1 %v591_v2 }
   0xb   :  { %528 = vmatpush3.bf16.xpose.msra.mxu0 %v568_v6  ;;  %550 = vmatpush3.bf16.msra.mxu1 %v569_v7 }
   0xc   :  { %529 = vmatprep.subr.bf16.mxu0 %v591_v2  ;;  %551 = vmatprep.subr.bf16.mxu1 %v591_v2 }
   0xf   :  { %552 = vmatpush3.bf16.msra.mxu1 %v570_v8 }
  0x10   :  { %553 = vmatprep.subr.bf16.mxu1 %v591_v2 }
  0x13   :  { %530 = vmatpush3.bf16.xpose.msra.mxu0 %v569_v7  ;;  %554 = vmatpush3.bf16.msra.mxu1 %v571_v9 }
  0x14   :  { %531 = vmatprep.subr.bf16.mxu0 %v591_v2  ;;  %555 = vmatprep.subr.bf16.mxu1 %v591_v2 }
  0x17   :  { %556 = vmatpush3.bf16.msra.mxu1 %v572_v10 }
  0x18   :  { %557 = vmatprep.subr.bf16.mxu1 %v591_v2 }
  0x1b   :  { %532 = vmatpush3.bf16.xpose.msra.mxu0 %v570_v8  ;;  %558 = vmatpush3.bf16.msra.mxu1 %v573_v11 }
  0x1c   :  { %533 = vmatprep.subr.bf16.mxu0 %v591_v2  ;;  %559 = vmatprep.subr.bf16.mxu1 %v591_v2 }
  0x1f   :  { %560 = vmatpush3.bf16.msra.mxu1 %v574_v12 }
  0x23   :  { %534 = vmatpush3.bf16.xpose.msra.mxu0 %v571_v9 }
  0x24   :  { %535 = vmatprep.subr.bf16.mxu0 %v591_v2 }
  0x2b   :  { %536 = vmatpush3.bf16.xpose.msra.mxu0 %v572_v10 }
  0x2c   :  { %537 = vmatprep.subr.bf16.mxu0 %v591_v2 }
  0x33   :  { %538 = vmatpush3.bf16.xpose.msra.mxu0 %v573_v11 }
  0x34   :  { %539 = vmatprep.subr.bf16.mxu0 %v591_v2 }
  0x3b   :  { %540 = vmatpush3.bf16.xpose.msra.mxu0 %v574_v12 }
  0x91   :  { %v20_v13 = vpop.xlane.xlu0 %19 }
  0x92   :  { %575 = vrsqrt.f32 %v20_v13  ;;  %vm25_vm1 = vcmp.eq.f32.partialorder %v20_v13, inf  ;;  %v28_v17 = vand.u32 2147483648, %v20_v13  ;;  %vm27_vm2 = vcmp.eq.f32.partialorder %v20_v13, 0.0 }
  0x95   :  { %v22_v14 = vpop.xlane.xlu0 %21 }
  0x96   :  { %577 = vrsqrt.f32 %v22_v14  ;;  %vm32_vm3 = vcmp.eq.f32.partialorder %v22_v14, inf  ;;  %v35_v23 = vand.u32 2147483648, %v22_v14  ;;  %vm34_vm4 = vcmp.eq.f32.partialorder %v22_v14, 0.0 }
  0x9c   :  { %v576_v15 = vpop.eup %575 }
  0x9d   :  { %v24_v16 = vmul.f32 %v576_v15, %v20_v13 }
  0x9f   :  { %v26_v18 = vsel %vm25_vm1, %v20_v13, %v24_v16 }
  0xa0   :  { %v578_v19 = vpop.eup %577  ;;  %v29_v20 = vsel %vm27_vm2, %v28_v17, %v26_v18 }
  0xa1   :  { %v37_v21 = vadd.f32 1e-08, %v29_v20  ;;  %v31_v22 = vmul.f32 %v578_v19, %v22_v14 }
  0xa3   :  { %v33_v24 = vsel %vm32_vm3, %v22_v14, %v31_v22  ;;  %579 = vrcp.f32 %v37_v21 }
  0xa4   :  { %v36_v25 = vsel %vm34_vm4, %v35_v23, %v33_v24 }
  0xa5   :  { %v38_v26 = vadd.f32 1e-08, %v36_v25 }
  0xa7   :  { %581 = vrcp.f32 %v38_v26 }
  0xad   :  { %v580_v27 = vpop.eup %579 }
  0xae   :  { %v41_v29 = vmul.f32 %v580_v27, %v616_v0 }
  0xb1   :  { %v582_v28 = vpop.eup %581 }
  0xb2   :  { %v42_v30 = vmul.f32 %v582_v28, %v621_v1 }
  0xb4   :  { %v43_v31 = vpack.c.bf16 %v42_v30, %v41_v29 }
  0xb6   :  { %542 = vmatmul.mubr.bf16.vlgmr.msra.gmra.mrb[0].mxu0 %v43_v31 }
 0x189   :  { %v142_v35 = vpop.f32.mrb[0].mxu0 }
 0x18a   :  { %v156_v36 = vmul.f32 %v506_v34, %v142_v35  ;;  %v543_v37 = vpop.f32.mrb[1].mxu0 }
 0x18b   :  { %v145_v38 = vpop.f32.mrb[2].mxu0 }
 0x18c   :  { %v656_v39 = vsel %vm160_vm5, %v156_v36, -inf  ;;  %v157_v40 = vmul.f32 %v506_v34, %v145_v38  ;;  %v544_v41 = vpop.f32.mrb[3].mxu0 }
 0x18d   :  { %v165_v42 = vshra.s32 %v656_v39, 31 }
 0x18e   :  { %v659_v43 = vsel %vm160_vm5, %v157_v40, -inf }
 0x18f   :  { %v167_v44 = vand.u32 2147483647, %v165_v42  ;;  %v166_v45 = vshra.s32 %v659_v43, 31 }
 0x191   :  { %v169_v46 = vxor.u32 %v167_v44, %v656_v39  ;;  %v168_v48 = vand.u32 2147483647, %v166_v45 }
 0x193   :  { %v171_v49 = vand.u32 4294967168, %v169_v46  ;;  %v170_v50 = vxor.u32 %v168_v48, %v659_v43 }
 0x195   :  { %v664_v51 = vor.u32 %v173_v47, %v171_v49  ;;  %v172_v52 = vand.u32 4294967168, %v170_v50 }
 0x197   :  { %v666_v53 = vor.u32 %v173_v47, %v172_v52  ;;  %v177_v54 = vshra.s32 %v664_v51, 16  ;;  %v176_v58 = vand.u32 65535, %v664_v51 }
 0x199   :  { %v179_v55 = vcvt.s32.f32 %v177_v54  ;;  %v191_v56 = vshra.s32 %v666_v53, 16  ;;  %v178_v60 = vcvt.s32.f32 %v176_v58  ;;  %v190_v61 = vand.u32 65535, %v666_v53 }
 0x19b   :  { %180 = vmax.xlane.f32.xlu1 %v179_v55  ;;  %v193_v57 = vcvt.s32.f32 %v191_v56  ;;  %v192_v0 = vcvt.s32.f32 %v190_v61 }
 0x19f   :  { %194 = vmax.xlane.f32.xlu1 %v193_v57 }
 0x228   :  { %v181_v59 = vpop.xlane.xlu1 %180 }
 0x229   :  { %vm182_vm6 = vcmp.eq.f32.partialorder %v179_v55, %v181_v59  ;;  %v187_v2 = vcvt.f32.s32 %v181_v59 }
 0x22a   :  { %v183_v62 = vsel %vm182_vm6, %v178_v60, -inf }
 0x22b   :  { %184 = vmax.xlane.f32.xlu0 %v183_v62  ;;  %v188_v4 = vshll.u32 %v187_v2, 16 }
 0x22c   :  { %v195_v63 = vpop.xlane.xlu1 %194 }
 0x22d   :  { %vm196_vm7 = vcmp.eq.f32.partialorder %v193_v57, %v195_v63  ;;  %v201_v5 = vcvt.f32.s32 %v195_v63 }
 0x22e   :  { %v197_v1 = vsel %vm196_vm7, %v192_v0, -inf }
 0x22f   :  { %198 = vmax.xlane.f32.xlu1 %v197_v1  ;;  %v202_v9 = vshll.u32 %v201_v5, 16 }
 0x2b8   :  { %v185_v3 = vpop.xlane.xlu0 %184 }
 0x2b9   :  { %v186_v6 = vcvt.f32.s32 %v185_v3 }
 0x2bb   :  { %v189_v7 = vadd.s32 %v188_v4, %v186_v6 }
 0x2bc   :  { %v199_v8 = vpop.xlane.xlu1 %198 }
 0x2bd   :  { %vm204_vm8 = vcmp.eq.s32.totalorder %v664_v51, %v189_v7  ;;  %v200_v10 = vcvt.f32.s32 %v199_v8 }
 0x2be   :  { %v206_v11 = vsel %vm204_vm8, 2147483648, %v664_v51 }
 0x2bf   :  { %v203_v12 = vadd.s32 %v202_v9, %v200_v10  ;;  %v209_v13 = vshra.s32 %v206_v11, 16  ;;  %v208_v18 = vand.u32 65535, %v206_v11 }
 0x2c1   :  { %vm205_vm9 = vcmp.eq.s32.totalorder %v666_v53, %v203_v12  ;;  %v211_v14 = vcvt.s32.f32 %v209_v13  ;;  %v210_v20 = vcvt.s32.f32 %v208_v18 }
 0x2c2   :  { %v207_v15 = vsel %vm205_vm9, 2147483648, %v666_v53 }
 0x2c3   :  { %212 = vmax.xlane.f32.xlu0 %v211_v14  ;;  %v223_v16 = vshra.s32 %v207_v15, 16  ;;  %v222_v21 = vand.u32 65535, %v207_v15 }
 0x2c5   :  { %v225_v17 = vcvt.s32.f32 %v223_v16  ;;  %v224_v24 = vcvt.s32.f32 %v222_v21 }
 0x2c7   :  { %226 = vmax.xlane.f32.xlu1 %v225_v17 }
 0x350   :  { %v213_v19 = vpop.xlane.xlu0 %212 }
 0x351   :  { %vm214_vm10 = vcmp.eq.f32.partialorder %v211_v14, %v213_v19  ;;  %v219_v26 = vcvt.f32.s32 %v213_v19 }
 0x352   :  { %v215_v22 = vsel %vm214_vm10, %v210_v20, -inf }
 0x353   :  { %216 = vmax.xlane.f32.xlu0 %v215_v22  ;;  %v220_v28 = vshll.u32 %v219_v26, 16 }
 0x354   :  { %v227_v23 = vpop.xlane.xlu1 %226 }
 0x355   :  { %vm228_vm11 = vcmp.eq.f32.partialorder %v225_v17, %v227_v23  ;;  %v233_v29 = vcvt.f32.s32 %v227_v23 }
 0x356   :  { %v229_v25 = vsel %vm228_vm11, %v224_v24, -inf }
 0x357   :  { %230 = vmax.xlane.f32.xlu1 %v229_v25  ;;  %v234_v33 = vshll.u32 %v233_v29, 16 }
 0x3e0   :  { %v217_v27 = vpop.xlane.xlu0 %216 }
 0x3e1   :  { %v218_v30 = vcvt.f32.s32 %v217_v27 }
 0x3e3   :  { %v221_v31 = vadd.s32 %v220_v28, %v218_v30 }
 0x3e4   :  { %v231_v32 = vpop.xlane.xlu1 %230 }
 0x3e5   :  { %vm236_vm12 = vcmp.eq.s32.totalorder %v206_v11, %v221_v31  ;;  %v232_v34 = vcvt.f32.s32 %v231_v32 }
 0x3e6   :  { %v238_v35 = vsel %vm236_vm12, 2147483648, %v206_v11 }
 0x3e7   :  { %v235_v36 = vadd.s32 %v234_v33, %v232_v34  ;;  %v241_v37 = vshra.s32 %v238_v35, 16  ;;  %v240_v44 = vand.u32 65535, %v238_v35 }
 0x3e9   :  { %vm237_vm13 = vcmp.eq.s32.totalorder %v207_v15, %v235_v36  ;;  %v243_v38 = vcvt.s32.f32 %v241_v37  ;;  %v242_v46 = vcvt.s32.f32 %v240_v44 }
 0x3ea   :  { %v239_v40 = vsel %vm237_vm13, 2147483648, %v207_v15 }
 0x3eb   :  { %244 = vmax.xlane.f32.xlu0 %v243_v38  ;;  %v255_v41 = vshra.s32 %v239_v40, 16  ;;  %v254_v47 = vand.u32 65535, %v239_v40 }
 0x3ed   :  { %v257_v42 = vcvt.s32.f32 %v255_v41  ;;  %v256_v50 = vcvt.s32.f32 %v254_v47 }
 0x3ef   :  { %258 = vmax.xlane.f32.xlu1 %v257_v42 }
 0x478   :  { %v245_v45 = vpop.xlane.xlu0 %244 }
 0x479   :  { %vm246_vm14 = vcmp.eq.f32.partialorder %v243_v38, %v245_v45  ;;  %v251_v54 = vcvt.f32.s32 %v245_v45 }
 0x47a   :  { %v247_v48 = vsel %vm246_vm14, %v242_v46, -inf }
 0x47b   :  { %248 = vmax.xlane.f32.xlu0 %v247_v48  ;;  %v252_v56 = vshll.u32 %v251_v54, 16 }
 0x47c   :  { %v259_v49 = vpop.xlane.xlu1 %258 }
 0x47d   :  { %vm260_vm15 = vcmp.eq.f32.partialorder %v257_v42, %v259_v49  ;;  %v265_v57 = vcvt.f32.s32 %v259_v49 }
 0x47e   :  { %v261_v52 = vsel %vm260_vm15, %v256_v50, -inf }
 0x47f   :  { %262 = vmax.xlane.f32.xlu1 %v261_v52  ;;  %v266_v61 = vshll.u32 %v265_v57, 16 }
 0x508   :  { %v249_v55 = vpop.xlane.xlu0 %248 }
 0x509   :  { %v250_v58 = vcvt.f32.s32 %v249_v55 }
 0x50b   :  { %v253_v59 = vadd.s32 %v252_v56, %v250_v58 }
 0x50c   :  { %v263_v60 = vpop.xlane.xlu1 %262 }
 0x50d   :  { %vm268_vm0 = vcmp.eq.s32.totalorder %v238_v35, %v253_v59  ;;  %v264_v62 = vcvt.f32.s32 %v263_v60 }
 0x50e   :  { %v270_v63 = vsel %vm268_vm0, 2147483648, %v238_v35 }
 0x50f   :  { %v267_v0 = vadd.s32 %v266_v61, %v264_v62  ;;  %v273_v1 = vshra.s32 %v270_v63, 16  ;;  %v272_v6 = vand.u32 65535, %v270_v63 }
 0x511   :  { %vm269_vm1 = vcmp.eq.s32.totalorder %v239_v40, %v267_v0  ;;  %v275_v2 = vcvt.s32.f32 %v273_v1  ;;  %v274_v8 = vcvt.s32.f32 %v272_v6 }
 0x512   :  { %v271_v3 = vsel %vm269_vm1, 2147483648, %v239_v40 }
 0x513   :  { %276 = vmax.xlane.f32.xlu0 %v275_v2  ;;  %v287_v4 = vshra.s32 %v271_v3, 16  ;;  %v286_v9 = vand.u32 65535, %v271_v3 }
 0x515   :  { %v289_v5 = vcvt.s32.f32 %v287_v4  ;;  %v288_v12 = vcvt.s32.f32 %v286_v9 }
 0x517   :  { %290 = vmax.xlane.f32.xlu1 %v289_v5 }
 0x5a0   :  { %v277_v7 = vpop.xlane.xlu0 %276 }
 0x5a1   :  { %vm278_vm2 = vcmp.eq.f32.partialorder %v275_v2, %v277_v7  ;;  %v283_v14 = vcvt.f32.s32 %v277_v7 }
 0x5a2   :  { %v279_v10 = vsel %vm278_vm2, %v274_v8, -inf }
 0x5a3   :  { %280 = vmax.xlane.f32.xlu0 %v279_v10  ;;  %v284_v16 = vshll.u32 %v283_v14, 16 }
 0x5a4   :  { %v291_v11 = vpop.xlane.xlu1 %290 }
 0x5a5   :  { %vm292_vm3 = vcmp.eq.f32.partialorder %v289_v5, %v291_v11  ;;  %v297_v17 = vcvt.f32.s32 %v291_v11 }
 0x5a6   :  { %v293_v13 = vsel %vm292_vm3, %v288_v12, -inf }
 0x5a7   :  { %294 = vmax.xlane.f32.xlu1 %v293_v13  ;;  %v298_v21 = vshll.u32 %v297_v17, 16 }
 0x630   :  { %v281_v15 = vpop.xlane.xlu0 %280 }
 0x631   :  { %v282_v18 = vcvt.f32.s32 %v281_v15 }
 0x633   :  { %v285_v19 = vadd.s32 %v284_v16, %v282_v18 }
 0x634   :  { %v295_v20 = vpop.xlane.xlu1 %294 }
 0x635   :  { %vm300_vm4 = vcmp.eq.s32.totalorder %v270_v63, %v285_v19  ;;  %v296_v22 = vcvt.f32.s32 %v295_v20 }
 0x636   :  { %v302_v23 = vsel %vm300_vm4, 2147483648, %v270_v63 }
 0x637   :  { %v299_v24 = vadd.s32 %v298_v21, %v296_v22  ;;  %v305_v25 = vshra.s32 %v302_v23, 16  ;;  %v304_v30 = vand.u32 65535, %v302_v23 }
 0x639   :  { %vm301_vm5 = vcmp.eq.s32.totalorder %v271_v3, %v299_v24  ;;  %v307_v26 = vcvt.s32.f32 %v305_v25  ;;  %v306_v32 = vcvt.s32.f32 %v304_v30 }
 0x63a   :  { %v303_v27 = vsel %vm301_vm5, 2147483648, %v271_v3 }
 0x63b   :  { %308 = vmax.xlane.f32.xlu0 %v307_v26  ;;  %v319_v28 = vshra.s32 %v303_v27, 16  ;;  %v318_v33 = vand.u32 65535, %v303_v27 }
 0x63d   :  { %v321_v29 = vcvt.s32.f32 %v319_v28  ;;  %v320_v36 = vcvt.s32.f32 %v318_v33 }
 0x63f   :  { %322 = vmax.xlane.f32.xlu1 %v321_v29 }
 0x6c8   :  { %v309_v31 = vpop.xlane.xlu0 %308 }
 0x6c9   :  { %vm310_vm6 = vcmp.eq.f32.partialorder %v307_v26, %v309_v31  ;;  %v315_v38 = vcvt.f32.s32 %v309_v31 }
 0x6ca   :  { %v311_v34 = vsel %vm310_vm6, %v306_v32, -inf }
 0x6cb   :  { %312 = vmax.xlane.f32.xlu0 %v311_v34  ;;  %v316_v41 = vshll.u32 %v315_v38, 16 }
 0x6cc   :  { %v323_v35 = vpop.xlane.xlu1 %322 }
 0x6cd   :  { %vm324_vm7 = vcmp.eq.f32.partialorder %v321_v29, %v323_v35  ;;  %v329_v42 = vcvt.f32.s32 %v323_v35 }
 0x6ce   :  { %v325_v37 = vsel %vm324_vm7, %v320_v36, -inf }
 0x6cf   :  { %326 = vmax.xlane.f32.xlu1 %v325_v37  ;;  %v330_v47 = vshll.u32 %v329_v42, 16 }
 0x758   :  { %v313_v40 = vpop.xlane.xlu0 %312 }
 0x759   :  { %v314_v44 = vcvt.f32.s32 %v313_v40 }
 0x75b   :  { %v317_v45 = vadd.s32 %v316_v41, %v314_v44 }
 0x75c   :  { %v327_v46 = vpop.xlane.xlu1 %326 }
 0x75d   :  { %vm332_vm8 = vcmp.eq.s32.totalorder %v302_v23, %v317_v45  ;;  %v328_v48 = vcvt.f32.s32 %v327_v46 }
 0x75e   :  { %v334_v49 = vsel %vm332_vm8, 2147483648, %v302_v23 }
 0x75f   :  { %v331_v50 = vadd.s32 %v330_v47, %v328_v48  ;;  %v337_v52 = vshra.s32 %v334_v49, 16  ;;  %v336_v58 = vand.u32 65535, %v334_v49 }
 0x761   :  { %vm333_vm9 = vcmp.eq.s32.totalorder %v303_v27, %v331_v50  ;;  %v339_v54 = vcvt.s32.f32 %v337_v52  ;;  %v338_v60 = vcvt.s32.f32 %v336_v58 }
 0x762   :  { %v335_v55 = vsel %vm333_vm9, 2147483648, %v303_v27 }
 0x763   :  { %340 = vmax.xlane.f32.xlu0 %v339_v54  ;;  %v351_v56 = vshra.s32 %v335_v55, 16  ;;  %v350_v61 = vand.u32 65535, %v335_v55 }
 0x765   :  { %v353_v57 = vcvt.s32.f32 %v351_v56  ;;  %v352_v0 = vcvt.s32.f32 %v350_v61 }
 0x767   :  { %354 = vmax.xlane.f32.xlu1 %v353_v57 }
 0x7f0   :  { %v341_v59 = vpop.xlane.xlu0 %340 }
 0x7f1   :  { %vm342_vm10 = vcmp.eq.f32.partialorder %v339_v54, %v341_v59  ;;  %v347_v2 = vcvt.f32.s32 %v341_v59 }
 0x7f2   :  { %v343_v62 = vsel %vm342_vm10, %v338_v60, -inf }
 0x7f3   :  { %344 = vmax.xlane.f32.xlu0 %v343_v62  ;;  %v348_v4 = vshll.u32 %v347_v2, 16 }
 0x7f4   :  { %v355_v63 = vpop.xlane.xlu1 %354 }
 0x7f5   :  { %vm356_vm11 = vcmp.eq.f32.partialorder %v353_v57, %v355_v63  ;;  %v361_v5 = vcvt.f32.s32 %v355_v63 }
 0x7f6   :  { %v357_v1 = vsel %vm356_vm11, %v352_v0, -inf }
 0x7f7   :  { %358 = vmax.xlane.f32.xlu1 %v357_v1  ;;  %v362_v9 = vshll.u32 %v361_v5, 16 }
 0x880   :  { %v345_v3 = vpop.xlane.xlu0 %344 }
 0x881   :  { %v346_v6 = vcvt.f32.s32 %v345_v3 }
 0x883   :  { %v349_v7 = vadd.s32 %v348_v4, %v346_v6 }
 0x884   :  { %v359_v8 = vpop.xlane.xlu1 %358 }
 0x885   :  { %vm364_vm12 = vcmp.eq.s32.totalorder %v334_v49, %v349_v7  ;;  %v360_v10 = vcvt.f32.s32 %v359_v8 }
 0x886   :  { %v366_v11 = vsel %vm364_vm12, 2147483648, %v334_v49 }
 0x887   :  { %v363_v12 = vadd.s32 %v362_v9, %v360_v10  ;;  %v369_v13 = vshra.s32 %v366_v11, 16  ;;  %v368_v18 = vand.u32 65535, %v366_v11 }
 0x889   :  { %vm365_vm13 = vcmp.eq.s32.totalorder %v335_v55, %v363_v12  ;;  %v371_v14 = vcvt.s32.f32 %v369_v13  ;;  %v370_v20 = vcvt.s32.f32 %v368_v18 }
 0x88a   :  { %v367_v15 = vsel %vm365_vm13, 2147483648, %v335_v55 }
 0x88b   :  { %372 = vmax.xlane.f32.xlu0 %v371_v14  ;;  %v383_v16 = vshra.s32 %v367_v15, 16  ;;  %v382_v21 = vand.u32 65535, %v367_v15 }
 0x88d   :  { %v385_v17 = vcvt.s32.f32 %v383_v16  ;;  %v384_v24 = vcvt.s32.f32 %v382_v21 }
 0x88f   :  { %386 = vmax.xlane.f32.xlu1 %v385_v17 }
 0x918   :  { %v373_v19 = vpop.xlane.xlu0 %372 }
 0x919   :  { %vm374_vm14 = vcmp.eq.f32.partialorder %v371_v14, %v373_v19  ;;  %v379_v26 = vcvt.f32.s32 %v373_v19 }
 0x91a   :  { %v375_v22 = vsel %vm374_vm14, %v370_v20, -inf }
 0x91b   :  { %376 = vmax.xlane.f32.xlu0 %v375_v22  ;;  %v380_v28 = vshll.u32 %v379_v26, 16 }
 0x91c   :  { %v387_v23 = vpop.xlane.xlu1 %386 }
 0x91d   :  { %vm388_vm15 = vcmp.eq.f32.partialorder %v385_v17, %v387_v23  ;;  %v393_v29 = vcvt.f32.s32 %v387_v23 }
 0x91e   :  { %v389_v25 = vsel %vm388_vm15, %v384_v24, -inf }
 0x91f   :  { %390 = vmax.xlane.f32.xlu1 %v389_v25  ;;  %v394_v33 = vshll.u32 %v393_v29, 16 }
 0x9a8   :  { %v377_v27 = vpop.xlane.xlu0 %376 }
 0x9a9   :  { %v378_v30 = vcvt.f32.s32 %v377_v27 }
 0x9ab   :  { %v381_v31 = vadd.s32 %v380_v28, %v378_v30 }
 0x9ac   :  { %v391_v32 = vpop.xlane.xlu1 %390 }
 0x9ad   :  { %v392_v34 = vcvt.f32.s32 %v391_v32  ;;  %vm396_vm0 = vcmp.eq.s32.totalorder %v366_v11, %v381_v31 }
 0x9ae   :  { %v398_v35 = vsel %vm396_vm0, 2147483648, %v366_v11 }
 0x9af   :  { %v395_v36 = vadd.s32 %v394_v33, %v392_v34  ;;  %v401_v37 = vshra.s32 %v398_v35, 16  ;;  %v400_v44 = vand.u32 65535, %v398_v35 }
 0x9b1   :  { %v403_v38 = vcvt.s32.f32 %v401_v37  ;;  %vm397_vm1 = vcmp.eq.s32.totalorder %v367_v15, %v395_v36  ;;  %v402_v46 = vcvt.s32.f32 %v400_v44 }
 0x9b2   :  { %v399_v40 = vsel %vm397_vm1, 2147483648, %v367_v15 }
 0x9b3   :  { %404 = vmax.xlane.f32.xlu0 %v403_v38  ;;  %v415_v41 = vshra.s32 %v399_v40, 16  ;;  %v414_v47 = vand.u32 65535, %v399_v40 }
 0x9b5   :  { %v417_v42 = vcvt.s32.f32 %v415_v41  ;;  %v416_v50 = vcvt.s32.f32 %v414_v47 }
 0x9b7   :  { %418 = vmax.xlane.f32.xlu1 %v417_v42 }
 0xa40   :  { %v405_v45 = vpop.xlane.xlu0 %404 }
 0xa41   :  { %vm406_vm2 = vcmp.eq.f32.partialorder %v403_v38, %v405_v45  ;;  %v411_v54 = vcvt.f32.s32 %v405_v45 }
 0xa42   :  { %v407_v48 = vsel %vm406_vm2, %v402_v46, -inf }
 0xa43   :  { %408 = vmax.xlane.f32.xlu0 %v407_v48  ;;  %v412_v56 = vshll.u32 %v411_v54, 16 }
 0xa44   :  { %v419_v49 = vpop.xlane.xlu1 %418 }
 0xa45   :  { %vm420_vm3 = vcmp.eq.f32.partialorder %v417_v42, %v419_v49  ;;  %v425_v57 = vcvt.f32.s32 %v419_v49 }
 0xa46   :  { %v421_v52 = vsel %vm420_vm3, %v416_v50, -inf }
 0xa47   :  { %422 = vmax.xlane.f32.xlu1 %v421_v52  ;;  %v426_v61 = vshll.u32 %v425_v57, 16 }
 0xad0   :  { %v409_v55 = vpop.xlane.xlu0 %408 }
 0xad1   :  { %v410_v58 = vcvt.f32.s32 %v409_v55 }
 0xad3   :  { %v413_v59 = vadd.s32 %v412_v56, %v410_v58 }
 0xad4   :  { %v423_v60 = vpop.xlane.xlu1 %422 }
 0xad5   :  { %v424_v62 = vcvt.f32.s32 %v423_v60  ;;  %vm428_vm4 = vcmp.ge.s32.totalorder %v664_v51, %v413_v59 }
 0xad6   :  { %v430_v63 = vsel %vm428_vm4, %v656_v39, -inf }
 0xad7   :  { %v427_v0 = vadd.s32 %v426_v61, %v424_v62  ;;  %432 = vmax.xlane.f32.xlu0 %v430_v63 }
 0xad9   :  { %vm429_vm5 = vcmp.ge.s32.totalorder %v666_v53, %v427_v0 }
 0xada   :  { %v431_v1 = vsel %vm429_vm5, %v659_v43, -inf }
 0xadb   :  { %434 = vmax.xlane.f32.xlu1 %v431_v1 }
 0xb64   :  { %v433_v2 = vpop.xlane.xlu0 %432 }
 0xb65   :  { %v436_v3 = vsub.f32 %v430_v63, %v433_v2 }
 0xb67   :  { %v438_v4 = vmul.f32 1.442695, %v436_v3 }
 0xb68   :  { %v435_v5 = vpop.xlane.xlu1 %434 }
 0xb69   :  { %583 = vpow2.f32 %v438_v4  ;;  %v437_v6 = vsub.f32 %v431_v1, %v435_v5 }
 0xb6b   :  { %v440_v7 = vmul.f32 1.442695, %v437_v6 }
 0xb6d   :  { %585 = vpow2.f32 %v440_v7 }
 0xb73   :  { %v584_v8 = vpop.eup %583 }
 0xb74   :  { %442 = vadd.xlane.f32.xlu0 %v584_v8 }
 0xb77   :  { %v586_v51 = vpop.eup %585 }
 0xb78   :  { %444 = vadd.xlane.f32.xlu1 %v586_v51  ;;  %v446_v39 = vpack.c.bf16 %v586_v51, %v584_v8 }
 0xb7a   :  { %562 = vmatmul.mubr.bf16.vlgmr.msra.gmra.mrb[0].mxu1 %v446_v39 }
 0xc01   :  { %v443_v9 = vpop.xlane.xlu0 %442 }
 0xc02   :  { %587 = vrcp.f32 %v443_v9 }
 0xc05   :  { %v445_v10 = vpop.xlane.xlu1 %444 }
 0xc06   :  { %589 = vrcp.f32 %v445_v10 }
 0xc0c   :  { %v588_v43 = vpop.eup %587 }
 0xc10   :  { %v590_v13 = vpop.eup %589 }
 0xc4d   :  { %v481_v53 = vpop.f32.mrb[0].mxu1 }
 0xc4e   :  { %v490_v11 = vmul.f32 %v588_v43, %v481_v53  ;;  %v563_v12 = vpop.f32.mrb[1].mxu1 }
 0xc4f   :  { %v484_v14 = vpop.f32.mrb[2].mxu1 }
 0xc50   :  { %492 = vst [vmem:[%s689_s3] sm:$0xff] %v490_v11  ;;  %v491_v15 = vmul.f32 %v590_v13, %v484_v14  ;;  %v564_v16 = vpop.f32.mrb[3].mxu1 }
 0xc52   :  { %493 = vst [vmem:[%s689_s3 + $0x8] sm:$0xff] %v491_v15 }

</bundles_post_ra>
